<compile_context>
chip_gen: v7x
topology: tpu7x:2x2x1
jax: 0.10.0
libtpu: 0.0.40
codegen_flags: <defaults>
</compile_context>

<pallas_src>
import functools
import math

import jax
import jax.numpy as jnp
from jax.experimental import pallas as pl
from jax.experimental.pallas import tpu as pltpu


def _round_up(x: int, m: int) -> int:
    return ((x + m - 1) // m) * m


def _grouped_kernel(tid_ref, x_ref, w1_ref, b1_ref, w2_ref, b2_ref, o_ref, *, activation):
    """One row tile of one type: (TM, K) @ (K, H) -> act -> (TM, H) @ (H, O).

    x:  (TM, Kmax)          w1: (1, Kmax, H)   b1: (1, 1, H)
    w2: (H, O)              b2: (1, O)         o:  (TM, O)
    """
    del tid_ref  # only used by the index_maps
    x = x_ref[...]
    w1 = w1_ref[0]          # (Kmax, H)
    b1 = b1_ref[0]          # (1, H)

    h = jnp.dot(x, w1, preferred_element_type=jnp.float32) + b1.astype(jnp.float32)
    if activation is not None:
        h = activation(h)   # elementwise activation, f32
    h = h.astype(w2_ref.dtype)

    out = jnp.dot(h, w2_ref[...], preferred_element_type=jnp.float32)
    out = out + b2_ref[...].astype(jnp.float32)
    o_ref[...] = out.astype(o_ref.dtype)


def hetero_to_homo_linear(feat, params, out_size, activation=None, *,
                          compute_dtype=None, tile_m=512):
    """Fused grouped Pallas implementation of HeteroToHomoLinear.forward."""
    w2, b2 = params["projector"]
    hidden = w2.shape[0]  # out_size // 2

    # ---- glue: collect 2-D per-type inputs (last time step of 3-D inputs) ----
    types = list(feat.keys())
    xs = []
    for typ in types:
        x = feat[typ]
        if x.ndim > 2:
            x = x[:, -1, :]
        xs.append(x)

    n_types = len(types)
    k_max = max(x.shape[1] for x in xs)
    row_counts = [x.shape[0] for x in xs]

    dtype = compute_dtype if compute_dtype is not None else xs[0].dtype
    sublane = 16 if dtype == jnp.bfloat16 else 8

    # Row tile: as large as useful (<=512) but never bigger than the biggest
    # type needs; every type's rows are padded to a multiple of TM so each
    # grid step is single-type.
    tm = max(sublane, min(tile_m, _round_up(max(max(row_counts), 1), sublane)))

    # ---- build concatenated row slab + per-tile type-id schedule -------------
    x_blocks = []
    tile_type_ids = []
    row_ranges = []  # (start, n_rows) of each type inside the padded slab
    off = 0
    for t, x in enumerate(xs):
        n, k = x.shape
        n_pad = _round_up(max(n, 1), tm)
        xp = jnp.zeros((n_pad, k_max), dtype).at[:n, :k].set(x.astype(dtype))
        x_blocks.append(xp)
        tile_type_ids.extend([t] * (n_pad // tm))
        row_ranges.append((off, n))
        off += n_pad
    x_all = jnp.concatenate(x_blocks, axis=0)          # (sum Np, Kmax)
    num_tiles = len(tile_type_ids)
    tile_type_ids = jnp.asarray(tile_type_ids, jnp.int32)

    # ---- stack per-type W1/b1 (K padded with zeros -> exact) -----------------
    w1_stack = jnp.zeros((n_types, k_max, hidden), dtype)
    b1_stack = jnp.zeros((n_types, 1, hidden), dtype)
    for t, typ in enumerate(types):
        w1, b1 = params["linears"][str(typ)]
        k = w1.shape[0]
        w1_stack = w1_stack.at[t, :k, :].set(w1.astype(dtype))
        b1_stack = b1_stack.at[t, 0, :].set(b1.astype(dtype))

    w2c = w2.astype(dtype)                              # (H, O)
    b2c = b2.reshape(1, -1).astype(dtype)               # (1, O)

    kernel = functools.partial(_grouped_kernel, activation=activation)
    out_all = pl.pallas_call(
        kernel,
        out_shape=jax.ShapeDtypeStruct((x_all.shape[0], out_size), jnp.float32),
        grid_spec=pltpu.PrefetchScalarGridSpec(
            num_scalar_prefetch=1,
            grid=(num_tiles,),
            in_specs=[
                # x tile: rows pipelined over the grid, full (tiny) K axis.
                pl.BlockSpec((tm, k_max), lambda g, tid: (g, 0)),
                # per-type first-layer weight/bias selected by prefetched type id.
                pl.BlockSpec((1, k_max, hidden), lambda g, tid: (tid[g], 0, 0)),
                pl.BlockSpec((1, 1, hidden), lambda g, tid: (tid[g], 0, 0)),
                # shared projector stays resident across the whole grid.
                pl.BlockSpec((hidden, out_size), lambda g, tid: (0, 0)),
                pl.BlockSpec((1, out_size), lambda g, tid: (0, 0)),
            ],
            out_specs=pl.BlockSpec((tm, out_size), lambda g, tid: (g, 0)),
        ),
        compiler_params=pltpu.CompilerParams(
            dimension_semantics=("parallel",),          # megacore on v7x
            vmem_limit_bytes=32 * 1024 * 1024,          # safe on v5e/v6e/v7x
        ),
    )(tile_type_ids, x_all, w1_stack, b1_stack, w2c, b2c)

    # ---- slice the lane-dense output slab back into the per-type dict --------
    out_feat = {}
    for typ, (start, n) in zip(types, row_ranges):
        out_feat[typ] = out_all[start:start + n, :]
    return out_feat


def init_params(in_size, out_size, key):
    """Deterministic init mirroring nn.Linear defaults
    (uniform(-1/sqrt(fan_in), 1/sqrt(fan_in)) for weight and bias)."""
    hidden = out_size // 2
    params = {"linears": {}}
    for typ, fan_in in in_size.items():
        key, kw, kb = jax.random.split(key, 3)
        bound = 1.0 / math.sqrt(fan_in)
        w = jax.random.uniform(kw, (fan_in, hidden), jnp.float32, -bound, bound)
        b = jax.random.uniform(kb, (hidden,), jnp.float32, -bound, bound)
        params["linears"][str(typ)] = (w, b)
    key, kw, kb = jax.random.split(key, 3)
    bound = 1.0 / math.sqrt(hidden)
    w = jax.random.uniform(kw, (hidden, out_size), jnp.float32, -bound, bound)
    b = jax.random.uniform(kb, (out_size,), jnp.float32, -bound, bound)
    params["projector"] = (w, b)
    return params


def _reference(feat, params, out_size, activation=None):
    """Pure-JAX reference matching the PyTorch forward exactly."""
    w2, b2 = params["projector"]
    out = {}
    for typ, x in feat.items():
        if x.ndim > 2:
            x = x[:, -1, :]
        w1, b1 = params["linears"][str(typ)]
        h = x @ w1 + b1
        if activation is not None:
            h = activation(h)
        out[typ] = h @ w2 + b2
    return out


if __name__ == "__main__":
    # Small shapes consistent with the module's example usage.
    in_size = {"user": 4, ("user", "follows", "user"): 6}
    out_size = 32  # hidden = 16
    activation = jax.nn.relu

    key = jax.random.PRNGKey(0)
    params = init_params(in_size, out_size, key)

    key, k1, k2 = jax.random.split(key, 3)
    feat = {
        "user": jax.random.normal(k1, (2, 4), jnp.float32),                          # 2-D path
        ("user", "follows", "user"): jax.random.normal(k2, (3, 8, 6), jnp.float32),  # 3-D path -> [:, -1, :]
    }

    out = hetero_to_homo_linear(feat, params, out_size, activation=activation)
    # Do NOT tree_map over `out`: mixing str and tuple dict keys breaks pytree
    # key sorting.  Block on the values directly.
    for v in out.values():
        jax.block_until_ready(v)

    ref = _reference(feat, params, out_size, activation=activation)
    for typ in feat:
        assert out[typ].shape == (feat[typ].shape[0], out_size), (typ, out[typ].shape)
        assert jnp.allclose(out[typ], ref[typ], atol=1e-5, rtol=1e-5), typ

    # bf16 compute path (full-rate MXU, half the HBM/VMEM traffic); f32 accum,
    # so only a loose tolerance vs the f32 reference is needed.
    out_bf16 = hetero_to_homo_linear(
        feat, params, out_size, activation=activation, compute_dtype=jnp.bfloat16)
    for v in out_bf16.values():
        jax.block_until_ready(v)
    for typ in feat:
        assert jnp.allclose(out_bf16[typ], ref[typ], atol=5e-2, rtol=5e-2), typ

    print("KERNEL_OK")
</pallas_src>

<mosaic_0001>
module attributes {stable_mosaic.version = 11 : i64} {
  func.func @_grouped_kernel(%arg0: i32, %arg1: memref<2xi32, #tpu.memory_space<smem>>, %arg2: memref<8x6xf32, #tpu.memory_space<vmem>>, %arg3: memref<1x6x16xf32, #tpu.memory_space<vmem>>, %arg4: memref<1x1x16xf32, #tpu.memory_space<vmem>>, %arg5: memref<16x32xf32, #tpu.memory_space<vmem>>, %arg6: memref<1x32xf32, #tpu.memory_space<vmem>>, %arg7: memref<8x32xf32, #tpu.memory_space<vmem>>) attributes {dimension_semantics = [#tpu.dimension_semantics<parallel>], iteration_bounds = array<i64: 2>, scalar_prefetch = 1 : i64, scratch_operands = 0 : i64, tpu.core_type = #tpu.core_type<tc>, window_params = [{transform_indices = @transform_0, window_bounds = array<i64: 8, 6>}, {transform_indices = @transform_1, window_bounds = array<i64: 1, 6, 16>}, {transform_indices = @transform_2, window_bounds = array<i64: 1, 1, 16>}, {pipeline_mode = #tpu.pipeline_mode<synchronous>, transform_indices = @transform_3, window_bounds = array<i64: 16, 32>}, {pipeline_mode = #tpu.pipeline_mode<synchronous>, transform_indices = @transform_4, window_bounds = array<i64: 1, 32>}, {transform_indices = @transform_5, window_bounds = array<i64: 8, 32>}]} {
    %c0 = arith.constant 0 : index
    %c0_0 = arith.constant 0 : index
    %0 = vector.load %arg2[%c0, %c0_0] : memref<8x6xf32, #tpu.memory_space<vmem>>, vector<8x6xf32>
    %c0_1 = arith.constant 0 : index
    %c0_2 = arith.constant 0 : index
    %c0_3 = arith.constant 0 : index
    %1 = vector.load %arg3[%c0_1, %c0_2, %c0_3] : memref<1x6x16xf32, #tpu.memory_space<vmem>>, vector<1x6x16xf32>
    %2 = vector.shape_cast %1 : vector<1x6x16xf32> to vector<6x16xf32>
    %c0_4 = arith.constant 0 : index
    %c0_5 = arith.constant 0 : index
    %c0_6 = arith.constant 0 : index
    %3 = vector.load %arg4[%c0_4, %c0_5, %c0_6] : memref<1x1x16xf32, #tpu.memory_space<vmem>>, vector<1x1x16xf32>
    %4 = vector.shape_cast %3 : vector<1x1x16xf32> to vector<1x16xf32>
    %cst = arith.constant dense<0.000000e+00> : vector<8x16xf32>
    %5 = tpu.matmul %0, %2, %cst {dimension_numbers = #tpu.dot_dimension_numbers<[1], [0], [0], [1], [0, 0, 1, 1], [], []>} : vector<8x6xf32>, vector<6x16xf32>, vector<8x16xf32> -> vector<8x16xf32>
    %6 = vector.broadcast %4 : vector<1x16xf32> to vector<8x16xf32>
    %7 = arith.addf %5, %6 : vector<8x16xf32>
    %cst_7 = arith.constant 0.000000e+00 : f32
    %8 = vector.broadcast %cst_7 : f32 to vector<8x16xf32>
    %9 = arith.maximumf %7, %8 : vector<8x16xf32>
    %c0_8 = arith.constant 0 : index
    %c0_9 = arith.constant 0 : index
    %10 = vector.load %arg5[%c0_8, %c0_9] : memref<16x32xf32, #tpu.memory_space<vmem>>, vector<16x32xf32>
    %cst_10 = arith.constant dense<0.000000e+00> : vector<8x32xf32>
    %11 = tpu.matmul %9, %10, %cst_10 {dimension_numbers = #tpu.dot_dimension_numbers<[1], [0], [0], [1], [0, 0, 1, 1], [], []>} : vector<8x16xf32>, vector<16x32xf32>, vector<8x32xf32> -> vector<8x32xf32>
    %c0_11 = arith.constant 0 : index
    %c0_12 = arith.constant 0 : index
    %12 = vector.load %arg6[%c0_11, %c0_12] : memref<1x32xf32, #tpu.memory_space<vmem>>, vector<1x32xf32>
    %13 = vector.broadcast %12 : vector<1x32xf32> to vector<8x32xf32>
    %14 = arith.addf %11, %13 : vector<8x32xf32>
    %c0_13 = arith.constant 0 : index
    %c0_14 = arith.constant 0 : index
    %15 = vector.load %arg7[%c0_13, %c0_14] : memref<8x32xf32, #tpu.memory_space<vmem>>, vector<8x32xf32>
    tpu.vector_store %arg7[%c0_13, %c0_14], %14 {strides = array<i32>} : memref<8x32xf32, #tpu.memory_space<vmem>>, vector<8x32xf32>,
    return
  }
  func.func @transform_0(%arg0: i32, %arg1: memref<2xi32, #tpu.memory_space<smem>>) -> (i32, i32) {
    %c0_i32 = arith.constant 0 : i32
    %c0_i32_0 = arith.constant 0 : i32
    return %arg0, %c0_i32 : i32, i32
  }
  func.func @transform_1(%arg0: i32, %arg1: memref<2xi32, #tpu.memory_space<smem>>) -> (i32, i32, i32) {
    %0 = arith.index_cast %arg0 : i32 to index
    %1 = memref.load %arg1[%0] : memref<2xi32, #tpu.memory_space<smem>>
    %c0_i32 = arith.constant 0 : i32
    %c0_i32_0 = arith.constant 0 : i32
    %c0_i32_1 = arith.constant 0 : i32
    return %1, %c0_i32, %c0_i32_0 : i32, i32, i32
  }
  func.func @transform_2(%arg0: i32, %arg1: memref<2xi32, #tpu.memory_space<smem>>) -> (i32, i32, i32) {
    %0 = arith.index_cast %arg0 : i32 to index
    %1 = memref.load %arg1[%0] : memref<2xi32, #tpu.memory_space<smem>>
    %c0_i32 = arith.constant 0 : i32
    %c0_i32_0 = arith.constant 0 : i32
    %c0_i32_1 = arith.constant 0 : i32
    return %1, %c0_i32, %c0_i32_0 : i32, i32, i32
  }
  func.func @transform_3(%arg0: i32, %arg1: memref<2xi32, #tpu.memory_space<smem>>) -> (i32, i32) {
    %c0_i32 = arith.constant 0 : i32
    %c0_i32_0 = arith.constant 0 : i32
    %c0_i32_1 = arith.constant 0 : i32
    return %c0_i32, %c0_i32_0 : i32, i32
  }
  func.func @transform_4(%arg0: i32, %arg1: memref<2xi32, #tpu.memory_space<smem>>) -> (i32, i32) {
    %c0_i32 = arith.constant 0 : i32
    %c0_i32_0 = arith.constant 0 : i32
    %c0_i32_1 = arith.constant 0 : i32
    return %c0_i32, %c0_i32_0 : i32, i32
  }
  func.func @transform_5(%arg0: i32, %arg1: memref<2xi32, #tpu.memory_space<smem>>) -> (i32, i32) {
    %c0_i32 = arith.constant 0 : i32
    %c0_i32_0 = arith.constant 0 : i32
    return %arg0, %c0_i32 : i32, i32
  }
}

</mosaic_0001>

<bundles_post_ra>
// kernel: tpu_custom_call.1
= control target key start
LH: loop header
LB: loop body
LE: loop exit
PB: predicated region body
PF: predicated region fallthrough
CT: control target
= control target key end

     0   :  { %s856_s0 = inlined_call_operand.vmem [shape: s32[2], index: 0, kind: input, shape index: {}]   ;;  %s857_s1 = inlined_call_operand.vmem [shape: f32[16,6], index: 1, kind: input, shape index: {}]   ;;  %s858_s2 = inlined_call_operand.vmem [shape: f32[2,6,16], index: 2, kind: input, shape index: {}]   ;;  %s859_s3 = inlined_call_operand.vmem [shape: f32[2,1,16], index: 3, kind: input, shape index: {}]   ;;  %s860_s4 = inlined_call_operand.vmem [shape: f32[16,32], index: 4, kind: input, shape index: {}]   ;;  %s861_s5 = inlined_call_operand.vmem [shape: f32[1,32], index: 5, kind: input, shape index: {}]   ;;  %s862_s6 = inlined_call_operand.hbm [shape: f32[16,32], index: 6, kind: output, shape index: {}]  }
   0x1   :  { %s11_s23 = sshll.u32 %s856_s0, 4  ;;  %s12_s23 = int_to_ptr.vmem [resolvable:$true] %s11_s23 }
   0x2   :  { %s618_s24 = scalar_lea.vmem %s12_s23, 16  ;;  %p623_p1 = scmp.lt.s32.totalorder %s12_s23, %s12_s23 }
   0x3   :  { %p619_p0 = scmp.ne.s32.totalorder %s12_s23, %s618_s24  ;;  %p624_p2 = scmp.lt.s32.totalorder %s618_s24, %s618_s24 }
   0x5   :  { %p625_p3 = por %p624_p2, %p623_p1 }
   0x7   :  { %p626_p4 = pnand %p625_p3, %p619_p0 }
   0x9   :  { %629 = shalt.err (!%p626_p4)  }
   0xa   :  { %s696_s25 = smov [#allocation3]  }
   0xb   :  { %14 = dma.vmem_to_smem %s12_s23, 16, %s696_s25, [#allocation2] }
   0xc   :  { %674 = dma.done.wait [#allocation2], 16 }
   0xd   :  { %675 = vsyncadd [#allocation2], 4294967280 }
   0xe   :  { %16 = sfence }
   0xf   :  { %17 = vsyncpa [#allocation5], 0 }
  0x10   :  { %19 = vsyncpa [#allocation5 + $0x1], 0  ;;  %s739_s26 = smov 0   ;;  %s741_s27 = smov 0  }
  0x11   :  { %s743_s0 = smov 0   ;;  %s745_s28 = smov 0  }
  0x12 LB: > { %s760_s29 = sadd.s32 4294967295, %s694_s28   ;;  %s539_s30 = sadd.s32 4294967294, %s694_s28   ;;  %s694_s28 = sphi %s745_s28, %s868_s28   ;;  %s690_s0 = sphi %s743_s0, %s867_s0   ;;  %s686_s27 = sphi %s741_s27, %s866_s27   ;;  %s682_s26 = sphi %s739_s26, %s865_s26  }
  0x13   : > { %s764_s7 = sadd.s32 1, %s694_s28   ;;  %s156_s8 = sadd.s32 1, %s690_s0 }
  0x14   : > { %s153_s9 = ssub.s32 %s694_s28, %s764_s7  ;;  %p166_p5 = scmp.ne.s32.totalorder %s690_s0, %s686_s27 }
  0x15   : > { %p154_p6 = scmp.eq.s32.totalorder %s153_s9, 0  ;;  %p167_p7 = scmp.eq.s32.totalorder %s760_s29, 1 }
  0x16   : > { %p172_p8 = scmp.ne.s32.totalorder %s686_s27, %s682_s26  ;;  %p173_p9 = scmp.eq.s32.totalorder %s539_s30, 1 }
  0x17   : > { %s775_s10 = scalar_select %p154_p6, %s690_s0, %s156_s8  }
  0x18   : > { %p777_p10 = por %p167_p7, %p166_p5  ;;  %p781_p11 = por %p173_p9, %p172_p8 }
  0x19   : > { %p542_p12 = scmp.ge.s32.totalorder %s694_s28, 1  ;;  %p221_p13 = scmp.lt.s32.totalorder %s694_s28, 3 }
  0x1b   : > { %p222_p0 = pnand %p542_p12, %p221_p13 }
  0x1c   : > { %s261_s13 = sld [smem:[#allocation3 + %s760_s29]] (!%p222_p0)  ;;  %p257_p1 = scmp.lt.s32.totalorder (!%p222_p0), %s760_s29, 1  ;;  %v697_v0 = vmov (!%p222_p0), 0.0   ;;  %vm698_vm0 = vmmov (!%p222_p0), 0   ;;  %vm285_vm1 = vcmask (!%p222_p0), 1045504   ;;  %vm281_vm2 = vcmask (!%p222_p0), 48128  }
  0x1d   : > { %225 = sbr.rel (%p222_p0) target bundleno = 487 (0x1e7), region = 40  ;;  %560 = vmatprep.subr.mxu0 (!%p222_p0), %v697_v0  ;;  %562 = vmatprep.mubr.msk.f32.mxu0 (!%p222_p0), %vm698_vm0, %v697_v0  ;;  %v360_v3 = vld [vmem:[%s860_s4] sm:$0xff] (!%p222_p0)  ;;  %v361_v4 = vld [vmem:[%s860_s4 + $0x8] sm:$0xff] (!%p222_p0)  ;;  %v699_v6 = vmov (!%p222_p0), 0.0|0.0   ;;  %s267_s8 = sld [smem:[#allocation3 + %s760_s29]] (!%p222_p0)  ;;  %vm369_vm3 = vcmask (!%p222_p0), 130048  }
  0x1e   : > { %569 = vmatprep.mubr.msk.f32.mxu1 (!%p222_p0), %vm698_vm0, %v697_v0  ;;  %v573_v5 = vpack.c.bf16 (!%p222_p0), %v361_v4, %v360_v3  ;;  %572 = vmatprep.subr.bf16.mxu1 (!%p222_p0), %v699_v6  ;;  %v549_v12 = vld [vmem:[%s861_s5] ss:$0 sm:$0xff] (!%p222_p0)  ;;  %vm443_vm4 = vcmask (!%p222_p0), 261120  }
  0x20   : > { %574 = vmatpush3.bf16.msra.mxu1 (!%p222_p0), %v573_v5 }
  0x22   : > { %p262_p2 = scmp.lt.s32.totalorder (!%p222_p0), %s261_s13, 1 }
  0x23   : > { %p268_p3 = scmp.lt.s32.totalorder (!%p222_p0), %s267_s8, 1 }
  0x24   : > { %s258_s14 = scalar_select %p257_p1, %s760_s29, 1 }
  0x25   : > { %s870_s13 = smov (!%p262_p2, %s261_s13), 1  ;;  %s872_s8 = smov (!%p268_p3, %s267_s8), 1 }
  0x26   : > { %s544_s15 = sshll.u32 %s258_s14, 3  ;;  %s545_s19 = sshll.u32 %s870_s13, 3 }
  0x27   : > { %s260_s18 = scalar_lea.vmem %s857_s1, %s544_s15  ;;  %s265_s22 = scalar_lea.vmem %s858_s2, %s545_s19 }
  0x28   : > { %v272_v1 = vld [vmem:[%s260_s18] sm:$0xff]  ;;  %s270_s14 = scalar_lea.vmem %s859_s3, %s872_s8  ;;  %s254_s15 = sand.u32 1, %s686_s27  }
  0x29   : > { %v273_v2 = vld [vmem:[%s265_s22] sm:$0x3f]  ;;  %s543_s16 = sshll.u32 %s254_s15, 3  ;;  %s552_s19 = sshll.u32 %s760_s29, 7 }
  0x2a   : > { %561 = vmatpush3.msk.msra.mxu0 %vm285_vm1, %v273_v2  ;;  %v546_v7 = vld [vmem:[%s270_s14] ss:$0 sm:$0xff]  ;;  %s256_s20 = scalar_lea.vmem [#allocation4], %s543_s16  ;;  %s814_s24 = scalar_lea.hbm %s862_s6, %s552_s19 }
  0x2b   : > { %563 = vmatmul.mubr.msk.f32.vlgmr.msra.gmra.mrb[0].mxu0 %vm281_vm2, %v272_v1  ;;  %s459_s21 = sshll.u32 %s256_s20, 4  ;;  %s446_s25 = scalar_lea.sflag [#allocation5], %s254_s15  ;;  %s816_s21 = int_to_ptr.vmem [resolvable:$true] %s459_s21 }
  0x2c   : > { %s630_s30 = scalar_lea.vmem %s816_s21, 128  ;;  %s700_s29 = smov [#allocation4]  }
  0x2d   : > { %p631_p4 = scmp.ne.s32.totalorder %s816_s21, %s630_s30  ;;  %s634_s8 = sshll.u32 %s700_s29, 4  ;;  %s635_s8 = int_to_ptr.vmem [resolvable:$false] %s634_s8 }
  0x2e   : > { %s636_s9 = scalar_lea.vmem %s635_s8, 256  ;;  %p637_p7 = scmp.lt.s32.totalorder %s816_s21, %s635_s8 }
  0x2f   : > { %p632_p5 = pnand %p631_p4, %p777_p10  ;;  %p638_p8 = scmp.lt.s32.totalorder %s636_s9, %s630_s30 }
  0x31   : > { %p633_p6 = pneg %p632_p5  ;;  %p639_p9 = por %p638_p8, %p637_p7 }
  0x33   : > { %p640_p12 = pnand %p639_p9, %p633_p6 }
  0xfe   : > { %v355_v8 = vpop.f32.mrb[0].mxu0 }
  0xff   : > { %v356_v9 = vadd.f32 %v546_v7, %v355_v8  ;;  %v564_v10 = vpop.f32.mrb[1].mxu0 }
 0x101   : > { %v359_v11 = vmax.f32 %v356_v9, 0.0 }
 0x103   : > { %570 = vmatmul.mubr.msk.f32.vlgmr.msra.gmra.mrb[0].mxu1 %vm369_vm3, %v359_v11 }
 0x1d6   : > { %v439_v13 = vpop.f32.mrb[0].mxu1 }
 0x1d7   : > { %v440_v14 = vadd.f32 %v549_v12, %v439_v13  ;;  %v571_v15 = vpop.f32.mrb[1].mxu1 }
 0x1d9   : > { %444 = vst.msk [vmem:[%s256_s20] sm:$0xff] %vm443_vm4, %v440_v14 }
 0x1da   : > { %643 = shalt.err (!%p640_p12)
}
 0x1db   : > { %s644_s13 = scalar_lea.hbm %s814_s24, 128  ;;  %s648_s16 = scalar_lea.hbm %s862_s6, 256 }
 0x1dc   : > { %p645_p13 = scmp.ne.s32.totalorder %s814_s24, %s644_s13  ;;  %p649_p2 = scmp.lt.u32.totalorder %s814_s24, %s862_s6 }
 0x1dd   : > { %p650_p3 = scmp.lt.u32.totalorder %s648_s16, %s644_s13  ;;  %p652_p5 = scmp.lt.u32.totalorder %s644_s13, %s814_s24 }
 0x1de   : > { %p646_p0 = pnand %p645_p13, %p777_p10 }
 0x1df   : > { %p651_p4 = por %p650_p3, %p649_p2 }
 0x1e0   : > { %p647_p1 = pneg %p646_p0 }
 0x1e1   : > { %p653_p6 = por %p652_p5, %p651_p4 }
 0x1e3   : > { %p654_p7 = pnand %p653_p6, %p647_p1 }
 0x1e5   : > { %657 = shalt.err (!%p654_p7)
}
 0x1e6   : > { %575 = dma.vmem_to_hbm [thread:$0]  (%p777_p10), %s816_s21, 128, %s814_s24, %s446_s25  }
 0x1e7 PF: > { %p581_p8 = scmp.ge.s32.totalorder %s694_s28, 2  ;;  %s471_s19 = sand.u32 1, %s682_s26  }
 0x1e8   : > { %s472_s20 = scalar_lea.sflag [#allocation5], %s471_s19 }
 0x1e9   : > { %p578_p9 = pnand %p581_p8, %p781_p11 }
 0x1eb   : > { %677 = dma.done.wait (!%p578_p9), %s472_s20, 128  }
 0x1ec   : > { %679 = vsyncadd (!%p578_p9), %s472_s20, 4294967168  ;;  %p22_p12 = scmp.ge.s32.totalorder %s764_s7, 4   ;;  %s865_s26 = smov %s686_s27 }
 0x1ed   : > { %s866_s27 = smov %s690_s0  ;;  %s867_s0 = smov %s775_s10 }
 0x1ee   : > { %s868_s28 = smov %s764_s7  ;;  %24 = sbr.rel (!%p22_p12) target bundleno = 18 (0x12), region = 81 }
 0x1f5   :  { %477 = vsyncpa [#allocation5], 1 }
 0x1f6   :  { %479 = vsyncpa [#allocation5 + $0x1], 1 }

</bundles_post_ra>
